<compile_context>
chip_gen: v5e
topology: v5e:2x2
jax: 0.10.0
libtpu: 0.0.40
codegen_flags: <defaults>
</compile_context>

<pallas_src>
import functools
import math

import jax
import jax.numpy as jnp
from jax.experimental import pallas as pl
from jax.experimental.pallas import tpu as pltpu


def _transition_kernel(x_ref, q_ref, w_ref, b_ref, o_ref):
    # x_ref: (Nb, Cin, T_S)     raw NCHW input tile, spatial flattened (whole row-pairs)
    # q_ref: (T_S, T_S//4)      constant 0/0.25 pooling matrix (tile-local 2x2 windows)
    # w_ref: (Cout, Cin)        BN-folded 1x1 conv weight (matmul dtype)
    # b_ref: (Cout, 1)          BN-folded conv bias (f32)
    # o_ref: (Nb, Cout, T_S//4) pooled output tile
    q = q_ref[...]
    w = w_ref[...]
    bias = b_ref[...]
    for b in range(x_ref.shape[0]):                      # static unroll: batch-blocking
        xb = x_ref[b].astype(q.dtype)                                    # (Cin, T_S)
        xp = jnp.dot(xb, q, preferred_element_type=jnp.float32)          # (Cin, T_So)  pooled
        y = jnp.dot(w, xp.astype(w.dtype), preferred_element_type=jnp.float32)
        o_ref[b] = (y + bias).astype(o_ref.dtype)


def _pick_spatial_tile(s, row_pair, cin, in_itemsize, target_bytes=4 << 20, max_lanes=1024):
    """Lane tile: full dim if small, else a multiple of lcm(row_pair, 128), byte-budgeted."""
    cap = max(1, min(max_lanes, target_bytes // max(cin * in_itemsize, 1)))
    if s <= cap:
        return s
    step = (row_pair * 128) // math.gcd(row_pair, 128)    # lcm(2W, 128)
    if step >= cap:
        return min(step, s)
    return (cap // step) * step


def _pool_matrix(t_s, w, dtype):
    """Q[s, p] = 0.25 iff flat input s=(h,w) lies in the 2x2 window of flat output p=(t,j)."""
    wo = w // 2
    t_so = t_s // 4
    s = jnp.arange(t_s)
    h, ww = s // w, s % w
    p = jnp.arange(t_so)
    t, j = p // wo, p % wo
    hit = (h[:, None] // 2 == t[None, :]) & (ww[:, None] // 2 == j[None, :])
    return (hit.astype(jnp.float32) * 0.25).astype(dtype)


@functools.partial(jax.jit, static_argnames=("matmul_dtype", "out_dtype"))
def transition_layer(x_nchw, gamma, beta, r_mean, r_var, conv_w, conv_b,
                     matmul_dtype=jnp.bfloat16, out_dtype=None):
    N, Cin, H, W = x_nchw.shape
    Cout = conv_w.shape[0]
    Ho, Wo = H // 2, W // 2
    eps = 1e-5
    out_dtype = x_nchw.dtype if out_dtype is None else jnp.dtype(out_dtype)

    # PyTorch AvgPool2d(2,2) floors; trim odd tails (rare copy, even dims are free).
    if H % 2 or W % 2:
        x_nchw = x_nchw[:, :, : 2 * Ho, : 2 * Wo]
    Ht, Wt = 2 * Ho, 2 * Wo
    S, So = Ht * Wt, Ho * Wo

    # Free (bitcast) reshape: channels second-minor, flattened spatial on lanes.
    x2 = x_nchw.reshape(N, Cin, S)
    in_isz = x2.dtype.itemsize
    mm_isz = jnp.dtype(matmul_dtype).itemsize

    # Fold BatchNorm (inference, running stats) into the 1x1 conv (O(Cin*Cout) prep).
    w2 = conv_w.reshape(Cout, Cin).astype(jnp.float32)
    scale = gamma.astype(jnp.float32) * jax.lax.rsqrt(r_var.astype(jnp.float32) + eps)
    shift = beta.astype(jnp.float32) - r_mean.astype(jnp.float32) * scale
    w_f = (w2 * scale[None, :]).astype(matmul_dtype)                     # (Cout, Cin)
    b_f = (conv_b.astype(jnp.float32) + w2 @ shift).reshape(Cout, 1)     # (Cout, 1)

    # Tiling: spatial tile covers whole input row-pairs; batch-block toward ~2 MiB/step.
    t_s = _pick_spatial_tile(S, 2 * Wt, Cin, in_isz)
    t_so = t_s // 4
    q = _pool_matrix(t_s, Wt, matmul_dtype)

    nb = int(min(N, 8, max(1, (2 << 20) // max(Cin * t_s * in_isz, 1))))
    n_sp = pl.cdiv(S, t_s)
    n_bb = pl.cdiv(N, nb)

    # Longer axis first so v7x megacore always has a parallel axis worth splitting.
    if n_sp >= n_bb:
        grid = (n_sp, n_bb)
        x_spec = pl.BlockSpec((nb, Cin, t_s), lambda s, b: (b, 0, s))
        o_spec = pl.BlockSpec((nb, Cout, t_so), lambda s, b: (b, 0, s))
        c_map = lambda s, b: (0, 0)
    else:
        grid = (n_bb, n_sp)
        x_spec = pl.BlockSpec((nb, Cin, t_s), lambda b, s: (b, 0, s))
        o_spec = pl.BlockSpec((nb, Cout, t_so), lambda b, s: (b, 0, s))
        c_map = lambda b, s: (0, 0)

    # VMEM limit from actual block footprint (double-buffered) + temps, capped at 32 MiB.
    x_blk = nb * Cin * t_s * in_isz
    o_blk = nb * Cout * t_so * jnp.dtype(out_dtype).itemsize
    need = (2 * (x_blk + o_blk)
            + 2 * (t_s * t_so + Cout * Cin + Cout) * mm_isz
            + Cin * t_s * mm_isz            # in-kernel cast/intermediate headroom
            + (4 << 20))
    vmem_limit = int(min(max(need, 16 << 20), 32 << 20))
    if need > (32 << 20):
        vmem_limit = int(need)

    out = pl.pallas_call(
        _transition_kernel,
        out_shape=jax.ShapeDtypeStruct((N, Cout, So), out_dtype),
        grid=grid,
        in_specs=[
            x_spec,
            pl.BlockSpec((t_s, t_so), c_map),
            pl.BlockSpec((Cout, Cin), c_map),
            pl.BlockSpec((Cout, 1), c_map),
        ],
        out_specs=o_spec,
        compiler_params=pltpu.CompilerParams(
            dimension_semantics=("parallel", "parallel"),
            vmem_limit_bytes=vmem_limit,
        ),
    )(x2, q, w_f, b_f)

    return out.reshape(N, Cout, Ho, Wo)


def reference(x_nchw, gamma, beta, r_mean, r_var, conv_w, conv_b, eps=1e-5):
    x = x_nchw.astype(jnp.float32)
    s = gamma / jnp.sqrt(r_var + eps)
    xn = (x - r_mean[None, :, None, None]) * s[None, :, None, None] \
        + beta[None, :, None, None]
    w2 = conv_w.reshape(conv_w.shape[0], conv_w.shape[1])
    y = jnp.einsum("nchw,oc->nohw", xn, w2) + conv_b[None, :, None, None]
    N, Co, H, W = y.shape
    return y.reshape(N, Co, H // 2, 2, W // 2, 2).mean(axis=(3, 5))


if __name__ == "__main__":
    N, Cin, Cout, H, W = 2, 4, 2, 16, 16

    key = jax.random.PRNGKey(0)
    kx, kg, kb, km, kv, kw, kcb = jax.random.split(key, 7)

    x = jax.random.normal(kx, (N, Cin, H, W), dtype=jnp.float32)
    gamma = jax.random.uniform(kg, (Cin,), minval=0.5, maxval=1.5, dtype=jnp.float32)
    beta = 0.1 * jax.random.normal(kb, (Cin,), dtype=jnp.float32)
    r_mean = 0.1 * jax.random.normal(km, (Cin,), dtype=jnp.float32)
    r_var = jax.random.uniform(kv, (Cin,), minval=0.5, maxval=1.5, dtype=jnp.float32)
    conv_w = 0.1 * jax.random.normal(kw, (Cout, Cin, 1, 1), dtype=jnp.float32)
    conv_b = 0.1 * jax.random.normal(kcb, (Cout,), dtype=jnp.float32)

    ref = reference(x, gamma, beta, r_mean, r_var, conv_w, conv_b)

    # Default fast path: bf16 MXU operands, f32 accumulation.
    out_bf16 = jax.block_until_ready(
        transition_layer(x, gamma, beta, r_mean, r_var, conv_w, conv_b))
    assert out_bf16.shape == (N, Cout, H // 2, W // 2), out_bf16.shape
    assert jnp.allclose(out_bf16, ref, atol=2e-2, rtol=2e-2), \
        float(jnp.max(jnp.abs(out_bf16 - ref)))

    # f32 path (same kernel, full-precision operands, tighter tolerance).
    out_f32 = jax.block_until_ready(
        transition_layer(x, gamma, beta, r_mean, r_var, conv_w, conv_b,
                         matmul_dtype=jnp.float32))
    assert out_f32.shape == (N, Cout, H // 2, W // 2), out_f32.shape
    assert jnp.allclose(out_f32, ref, atol=1e-3, rtol=1e-3), \
        float(jnp.max(jnp.abs(out_f32 - ref)))

    print("KERNEL_OK")
</pallas_src>

<mosaic_0001>
module attributes {stable_mosaic.version = 11 : i64} {
  func.func @_transition_kernel(%arg0: i32, %arg1: i32, %arg2: memref<2x4x256xf32, #tpu.memory_space<vmem>>, %arg3: memref<256x64xbf16, #tpu.memory_space<vmem>>, %arg4: memref<2x4xbf16, #tpu.memory_space<vmem>>, %arg5: memref<2x1xf32, #tpu.memory_space<vmem>>, %arg6: memref<2x2x64xf32, #tpu.memory_space<vmem>>) attributes {dimension_semantics = [#tpu.dimension_semantics<parallel>, #tpu.dimension_semantics<parallel>], iteration_bounds = array<i64: 1, 1>, scalar_prefetch = 0 : i64, scratch_operands = 0 : i64, tpu.core_type = #tpu.core_type<tc>, window_params = [{transform_indices = @transform_0, window_bounds = array<i64: 2, 4, 256>}, {pipeline_mode = #tpu.pipeline_mode<synchronous>, transform_indices = @transform_1, window_bounds = array<i64: 256, 64>}, {pipeline_mode = #tpu.pipeline_mode<synchronous>, transform_indices = @transform_2, window_bounds = array<i64: 2, 4>}, {pipeline_mode = #tpu.pipeline_mode<synchronous>, transform_indices = @transform_3, window_bounds = array<i64: 2, 1>}, {transform_indices = @transform_4, window_bounds = array<i64: 2, 2, 64>}]} {
    %c0 = arith.constant 0 : index
    %c0_0 = arith.constant 0 : index
    %0 = vector.load %arg3[%c0, %c0_0] : memref<256x64xbf16, #tpu.memory_space<vmem>>, vector<256x64xbf16>
    %c0_1 = arith.constant 0 : index
    %c0_2 = arith.constant 0 : index
    %1 = vector.load %arg4[%c0_1, %c0_2] : memref<2x4xbf16, #tpu.memory_space<vmem>>, vector<2x4xbf16>
    %c0_3 = arith.constant 0 : index
    %c0_4 = arith.constant 0 : index
    %2 = vector.load %arg5[%c0_3, %c0_4] : memref<2x1xf32, #tpu.memory_space<vmem>>, vector<2x1xf32>
    %c0_5 = arith.constant 0 : index
    %c0_6 = arith.constant 0 : index
    %c0_7 = arith.constant 0 : index
    %3 = vector.load %arg2[%c0_5, %c0_6, %c0_7] : memref<2x4x256xf32, #tpu.memory_space<vmem>>, vector<1x4x256xf32>
    %4 = vector.shape_cast %3 : vector<1x4x256xf32> to vector<4x256xf32>
    %5 = arith.truncf %4 : vector<4x256xf32> to vector<4x256xbf16>
    %cst = arith.constant dense<0.000000e+00> : vector<4x64xf32>
    %6 = tpu.matmul %5, %0, %cst {dimension_numbers = #tpu.dot_dimension_numbers<[1], [0], [0], [1], [0, 0, 1, 1], [], []>} : vector<4x256xbf16>, vector<256x64xbf16>, vector<4x64xf32> -> vector<4x64xf32>
    %7 = arith.truncf %6 : vector<4x64xf32> to vector<4x64xbf16>
    %cst_8 = arith.constant dense<0.000000e+00> : vector<2x64xf32>
    %8 = tpu.matmul %1, %7, %cst_8 {dimension_numbers = #tpu.dot_dimension_numbers<[1], [0], [0], [1], [0, 0, 1, 1], [], []>} : vector<2x4xbf16>, vector<4x64xbf16>, vector<2x64xf32> -> vector<2x64xf32>
    %9 = vector.broadcast %2 : vector<2x1xf32> to vector<2x64xf32>
    %10 = arith.addf %8, %9 : vector<2x64xf32>
    %c0_9 = arith.constant 0 : index
    %c0_10 = arith.constant 0 : index
    %c0_11 = arith.constant 0 : index
    %11 = vector.load %arg6[%c0_9, %c0_10, %c0_11] : memref<2x2x64xf32, #tpu.memory_space<vmem>>, vector<1x2x64xf32>
    %12 = vector.shape_cast %11 : vector<1x2x64xf32> to vector<2x64xf32>
    %13 = vector.shape_cast %10 : vector<2x64xf32> to vector<1x2x64xf32>
    tpu.vector_store %arg6[%c0_9, %c0_10, %c0_11], %13 {strides = array<i32>} : memref<2x2x64xf32, #tpu.memory_space<vmem>>, vector<1x2x64xf32>,
    %c1 = arith.constant 1 : index
    %c0_12 = arith.constant 0 : index
    %c0_13 = arith.constant 0 : index
    %14 = vector.load %arg2[%c1, %c0_12, %c0_13] : memref<2x4x256xf32, #tpu.memory_space<vmem>>, vector<1x4x256xf32>
    %15 = vector.shape_cast %14 : vector<1x4x256xf32> to vector<4x256xf32>
    %16 = arith.truncf %15 : vector<4x256xf32> to vector<4x256xbf16>
    %cst_14 = arith.constant dense<0.000000e+00> : vector<4x64xf32>
    %17 = tpu.matmul %16, %0, %cst_14 {dimension_numbers = #tpu.dot_dimension_numbers<[1], [0], [0], [1], [0, 0, 1, 1], [], []>} : vector<4x256xbf16>, vector<256x64xbf16>, vector<4x64xf32> -> vector<4x64xf32>
    %18 = arith.truncf %17 : vector<4x64xf32> to vector<4x64xbf16>
    %cst_15 = arith.constant dense<0.000000e+00> : vector<2x64xf32>
    %19 = tpu.matmul %1, %18, %cst_15 {dimension_numbers = #tpu.dot_dimension_numbers<[1], [0], [0], [1], [0, 0, 1, 1], [], []>} : vector<2x4xbf16>, vector<4x64xbf16>, vector<2x64xf32> -> vector<2x64xf32>
    %20 = vector.broadcast %2 : vector<2x1xf32> to vector<2x64xf32>
    %21 = arith.addf %19, %20 : vector<2x64xf32>
    %c1_16 = arith.constant 1 : index
    %c0_17 = arith.constant 0 : index
    %c0_18 = arith.constant 0 : index
    %22 = vector.load %arg6[%c1_16, %c0_17, %c0_18] : memref<2x2x64xf32, #tpu.memory_space<vmem>>, vector<1x2x64xf32>
    %23 = vector.shape_cast %22 : vector<1x2x64xf32> to vector<2x64xf32>
    %24 = vector.shape_cast %21 : vector<2x64xf32> to vector<1x2x64xf32>
    tpu.vector_store %arg6[%c1_16, %c0_17, %c0_18], %24 {strides = array<i32>} : memref<2x2x64xf32, #tpu.memory_space<vmem>>, vector<1x2x64xf32>,
    return
  }
  func.func @transform_0(%arg0: i32, %arg1: i32) -> (i32, i32, i32) {
    %c0_i32 = arith.constant 0 : i32
    %c0_i32_0 = arith.constant 0 : i32
    return %arg1, %c0_i32, %arg0 : i32, i32, i32
  }
  func.func @transform_1(%arg0: i32, %arg1: i32) -> (i32, i32) {
    %c0_i32 = arith.constant 0 : i32
    %c0_i32_0 = arith.constant 0 : i32
    %c0_i32_1 = arith.constant 0 : i32
    return %c0_i32, %c0_i32_0 : i32, i32
  }
  func.func @transform_2(%arg0: i32, %arg1: i32) -> (i32, i32) {
    %c0_i32 = arith.constant 0 : i32
    %c0_i32_0 = arith.constant 0 : i32
    %c0_i32_1 = arith.constant 0 : i32
    return %c0_i32, %c0_i32_0 : i32, i32
  }
  func.func @transform_3(%arg0: i32, %arg1: i32) -> (i32, i32) {
    %c0_i32 = arith.constant 0 : i32
    %c0_i32_0 = arith.constant 0 : i32
    %c0_i32_1 = arith.constant 0 : i32
    return %c0_i32, %c0_i32_0 : i32, i32
  }
  func.func @transform_4(%arg0: i32, %arg1: i32) -> (i32, i32, i32) {
    %c0_i32 = arith.constant 0 : i32
    %c0_i32_0 = arith.constant 0 : i32
    return %arg1, %c0_i32, %arg0 : i32, i32, i32
  }
}

</mosaic_0001>

<bundles_post_ra>
// kernel: transition_layer.1
= control target key start
LH: loop header
LB: loop body
LE: loop exit
PB: predicated region body
PF: predicated region fallthrough
CT: control target
= control target key end

     0   :  { %vm193_vm0 = vcmask 1041408   ;;  %v357_v28 = vmov 0   ;;  %vm189_vm1 = vcmask 31744   ;;  %vm210_vm2 = vcmask 517120   ;;  %s461_s1 = inlined_call_operand.vmem [shape: bf16[256,64], index: 1, kind: input, shape index: {}]   ;;  %s462_s0 = inlined_call_operand.vmem [shape: f32[2,4,256], index: 0, kind: input, shape index: {}]   ;;  %s463_s2 = inlined_call_operand.vmem [shape: bf16[2,4], index: 2, kind: input, shape index: {}]   ;;  %s464_s3 = inlined_call_operand.vmem [shape: f32[2,1], index: 3, kind: input, shape index: {}]   ;;  %s465_s4 = inlined_call_operand.vmem [shape: f32[2,2,64], index: 4, kind: output, shape index: {}]  }
   0x1   :  { %v346_v0 = vld [vmem:[%s461_s1 + $0x38] sm:$0xff]  ;;  %v345_v2 = vld [vmem:[%s461_s1 + $0x30] sm:$0xff]  ;;  %v52_v4 = vld [vmem:[%s462_s0] sm:$0xff]  ;;  %356 = vset.pattern.permute.xlu0 %v357_v28 }
   0x2   :  { %v389_v1 = vld [vmem:[%s461_s1 + $0x78] sm:$0xff]  ;;  %157 = vmatpush.bf16.msra.mxu0 %v346_v0  ;;  %v398_v3 = vld [vmem:[%s461_s1 + $0x70] sm:$0xff]  ;;  %222 = vmatpush.bf16.msra.mxu3 %v346_v0  ;;  %v344_v5 = vld [vmem:[%s461_s1 + $0x28] sm:$0xff]  ;;  %54 = vst [vmem:[#allocation1] ss:$2 sm:$0xff] %v52_v4 }
   0x3   :  { %170 = vmatpush.bf16.msra.mxu1 %v389_v1  ;;  %v352_v6 = vld [vmem:[%s461_s1 + $0x68] sm:$0xff]  ;;  %v343_v7 = vld [vmem:[%s461_s1 + $0x20] sm:$0xff]  ;;  %v342_v12 = vld [vmem:[%s461_s1 + $0x18] sm:$0xff] }
   0x4   :  { %v351_v8 = vld [vmem:[%s461_s1 + $0x60] sm:$0xff]  ;;  %v336_v9 = vld [vmem:[%s462_s0 + $0x8] sm:$0xff]  ;;  %v350_v13 = vld [vmem:[%s461_s1 + $0x58] sm:$0xff] }
   0x5   :  { %v341_v14 = vld [vmem:[%s461_s1 + $0x10] sm:$0xff]  ;;  %v340_v16 = vld [vmem:[%s461_s1 + $0x8] sm:$0xff]  ;;  %v339_v18 = vld [vmem:[%s461_s1] sm:$0xff] }
   0x6   :  { %158 = vmatpush.bf16.msra.mxu0 %v345_v2  ;;  %223 = vmatpush.bf16.msra.mxu3 %v345_v2  ;;  %v349_v15 = vld [vmem:[%s461_s1 + $0x50] sm:$0xff]  ;;  %v348_v17 = vld [vmem:[%s461_s1 + $0x48] sm:$0xff]  ;;  %v347_v19 = vld [vmem:[%s461_s1 + $0x40] sm:$0xff] }
   0x7   :  { %171 = vmatpush.bf16.msra.mxu1 %v398_v3  ;;  %v50_v30 = vld [vmem:[%s463_s2] sm:$0x1] }
   0x8   :  { %v51_v31 = vld [vmem:[%s464_s3] sm:$0x3] }
   0x9   :  { %v55_v10 = vld.sshfl [vmem:[#allocation1] sm:$0xff pattern:$0x75316420]  ;;  %v56_v11 = vld.sshfl [vmem:[#allocation1 + $0x8] sm:$0xff pattern:$0x75316420]  ;;  %186 = vperm.xlu0 %356, %v51_v31  }
   0xa   :  { %159 = vmatpush.bf16.msra.mxu0 %v344_v5  ;;  %224 = vmatpush.bf16.msra.mxu3 %v344_v5  ;;  %215 = vst [vmem:[#allocation1] ss:$2 sm:$0xff] %v336_v9  ;;  %v59_v20 = vpack.c.bf16 %v55_v10, %v55_v10  ;;  %v60_v21 = vpack.c.bf16 %v56_v11, %v56_v11 }
   0xb   :  { %172 = vmatpush.bf16.msra.mxu1 %v352_v6 }
   0xe   :  { %160 = vmatpush.bf16.msra.mxu0 %v343_v7  ;;  %225 = vmatpush.bf16.msra.mxu3 %v343_v7 }
   0xf   :  { %173 = vmatpush.bf16.msra.mxu1 %v351_v8 }
  0x11   :  { %v216_v22 = vld.sshfl [vmem:[#allocation1] sm:$0xff pattern:$0x75316420]  ;;  %v217_v34 = vld.sshfl [vmem:[#allocation1 + $0x8] sm:$0xff pattern:$0x75316420] }
  0x12   :  { %161 = vmatpush.bf16.msra.mxu0 %v342_v12  ;;  %226 = vmatpush.bf16.msra.mxu3 %v342_v12  ;;  %v220_v23 = vpack.c.bf16 %v216_v22, %v216_v22  ;;  %v221_v35 = vpack.c.bf16 %v217_v34, %v217_v34 }
  0x13   :  { %174 = vmatpush.bf16.msra.mxu1 %v350_v13 }
  0x16   :  { %162 = vmatpush.bf16.msra.mxu0 %v341_v14  ;;  %227 = vmatpush.bf16.msra.mxu3 %v341_v14 }
  0x17   :  { %175 = vmatpush.bf16.msra.mxu1 %v349_v15 }
  0x1a   :  { %163 = vmatpush.bf16.msra.mxu0 %v340_v16  ;;  %228 = vmatpush.bf16.msra.mxu3 %v340_v16 }
  0x1b   :  { %176 = vmatpush.bf16.msra.mxu1 %v348_v17 }
  0x1e   :  { %164 = vmatpush.bf16.msra.mxu0 %v339_v18  ;;  %229 = vmatpush.bf16.msra.mxu3 %v339_v18 }
  0x1f   :  { %177 = vmatpush.bf16.msra.mxu1 %v347_v19 }
  0x21   :  { %165 = vmatmul.bf16.vlgmr.msra.gmra.mxu0 %v59_v20  ;;  %230 = vmatmul.bf16.vlgmr.msra.gmra.mxu3 %v220_v23 }
  0x22   :  { %178 = vmatmul.bf16.vlgmr.msra.gmra.mxu1 %v60_v21 }
  0x7b   :  { %v187_v38 = vpop.permute.xlu0 %186 }
  0x9e   :  { %v166_v24 = vpop.f32.mrf.mxu0 }
  0x9f   :  { %v179_v25 = vpop.f32.mrf.mxu1 }
  0xa0   :  { %v180_v26 = vadd.f32 %v179_v25, %v166_v24 }
  0xa2   :  { %v183_v27 = vpack.c.bf16 %v180_v26, %v180_v26 }
  0xa4   :  { %v195_v29 = vsel %vm193_vm0, %v183_v27, 0  ;;  %v231_v36 = vpop.f32.mrf.mxu3 }
  0xa5   :  { %204 = vmatpush.bf16.msra.mxu2 %v195_v29 }
  0xa6   :  { %v168_v32 = vpop.f32.mrf.mxu0 }
  0xa7   :  { %v181_v33 = vpop.f32.mrf.mxu1 }
  0xa8   :  { %335 = vmatmul.msk.bf16.vlgmr.msra.gmra.mxu2 %vm189_vm1, %v50_v30 }
  0xa9   :  { %235 = vmatpush.bf16.msrb.mxu2 %v389_v1 }
  0xac   :  { %v233_v37 = vpop.f32.mrf.mxu3 }
  0xad   :  { %236 = vmatpush.bf16.msrb.mxu2 %v398_v3 }
  0xb1   :  { %237 = vmatpush.bf16.msrb.mxu2 %v352_v6 }
  0xb5   :  { %238 = vmatpush.bf16.msrb.mxu2 %v351_v8 }
  0xb9   :  { %239 = vmatpush.bf16.msrb.mxu2 %v350_v13 }
  0xbd   :  { %240 = vmatpush.bf16.msrb.mxu2 %v349_v15 }
  0xc1   :  { %241 = vmatpush.bf16.msrb.mxu2 %v348_v17 }
  0xc5   :  { %242 = vmatpush.bf16.msrb.mxu2 %v347_v19 }
  0xc8   :  { %243 = vmatmul.bf16.vlgmr.msrb.gmra.mxu2 %v221_v35 }
 0x12b   :  { %v206_v39 = vpop.f32.mrf.mxu2 }
 0x12c   :  { %v207_v40 = vadd.f32 %v206_v39, %v187_v38 }
 0x12e   :  { %211 = vst.msk [vmem:[%s465_s4] sm:$0x3] %vm210_vm2, %v207_v40 }
 0x133   :  { %v208_v41 = vpop.f32.mrf.mxu2 }
 0x14b   :  { %v244_v42 = vpop.f32.mrf.mxu2 }
 0x14c   :  { %v245_v43 = vadd.f32 %v244_v42, %v231_v36 }
 0x14e   :  { %v248_v44 = vpack.c.bf16 %v245_v43, %v245_v43 }
 0x150   :  { %v250_v45 = vsel %vm193_vm0, %v248_v44, 0 }
 0x151   :  { %259 = vmatpush.bf16.msrb.mxu0 %v250_v45 }
 0x153   :  { %v246_v46 = vpop.f32.mrf.mxu2 }
 0x154   :  { %337 = vmatmul.msk.bf16.vlgmr.msrb.gmra.mxu0 %vm189_vm1, %v50_v30 }
 0x1d1   :  { %v261_v47 = vpop.f32.mrf.mxu0 }
 0x1d2   :  { %v262_v48 = vadd.f32 %v261_v47, %v187_v38 }
 0x1d4   :  { %338 = vst.msk [vmem:[%s465_s4 + $0x2] sm:$0x3] %vm210_vm2, %v262_v48 }
 0x1d9   :  { %v263_v49 = vpop.f32.mrf.mxu0 }

</bundles_post_ra>
